<compile_context>
chip_gen: v7x
topology: tpu7x:2x2x1
jax: 0.10.0
libtpu: 0.0.40
codegen_flags: <defaults>
</compile_context>

<pallas_src>
import functools

import jax
import jax.numpy as jnp
from jax.experimental import pallas as pl
from jax.experimental.pallas import tpu as pltpu

LANE = 128
MAX_BLOCK_ROWS = 2048   # (2048,128) f32 block = 1 MiB; fits every generation's VMEM budget


def _dropadj_kernel(seed_ref, val_ref, out_val_ref, mask_ref, *,
                    threshold, ratio, nnz, block_rows):
    # Stateless counter-based RNG: hash (global element index, seed) with the
    # murmur3 fmix32 finalizer.  Pure VPU integer work, no hardware PRNG state.
    base = pl.program_id(0) * block_rows
    row_ids = jax.lax.broadcasted_iota(jnp.int32, val_ref.shape, 0)
    lane_ids = jax.lax.broadcasted_iota(jnp.int32, val_ref.shape, 1)
    idx = (base + row_ids) * LANE + lane_ids            # global flat index (int32)

    h = idx.astype(jnp.uint32) ^ (seed_ref[0].astype(jnp.uint32)
                                  * jnp.uint32(0x9E3779B9))
    h = h * jnp.uint32(0x9E3779B1)
    h = h ^ (h >> 16)
    h = h * jnp.uint32(0x85EBCA6B)
    h = h ^ (h >> 13)
    h = h * jnp.uint32(0xC2B2AE35)
    h = h ^ (h >> 16)

    # keep iff uniform > dp  <=>  h > dp * 2^32 (single unsigned compare);
    # also zero out the padded tail past nnz.
    keep = (h > jnp.uint32(threshold)) & (idx < nnz)

    out_val_ref[...] = jnp.where(
        keep, val_ref[...] * jnp.float32(ratio), jnp.float32(0.0)
    ).astype(out_val_ref.dtype)
    mask_ref[...] = keep.astype(jnp.int8)


def drop_adj(row, col, values, *, dp=0.0, doscale=True, training=True, seed=0):
    """Pallas equivalent of DropAdj.forward on a COO adjacency (row, col, values)."""
    if dp < 1e-6 or not training:
        return row, col, values, jnp.ones(values.shape, jnp.int8)

    nnz = values.shape[0]
    npad = pl.cdiv(nnz, LANE) * LANE
    # TODO(synk): callers that can hand over a (rows, 128) f32 buffer directly
    # avoid this pad/reshape pass (one extra HBM sweep before the kernel).
    vmat = jnp.pad(values.astype(jnp.float32), (0, npad - nnz)).reshape(-1, LANE)
    rows = vmat.shape[0]

    block_rows = min(MAX_BLOCK_ROWS, rows)   # full-dim block for small inputs
    grid = (pl.cdiv(rows, block_rows),)

    ratio = (1.0 / (1.0 - dp)) if doscale else 1.0
    threshold = min(max(int(dp * 4294967296.0), 0), 4294967295)

    kernel = functools.partial(
        _dropadj_kernel,
        threshold=threshold, ratio=float(ratio), nnz=nnz, block_rows=block_rows)

    out_vals, mask = pl.pallas_call(
        kernel,
        out_shape=(
            jax.ShapeDtypeStruct((rows, LANE), jnp.float32),
            jax.ShapeDtypeStruct((rows, LANE), jnp.int8),
        ),
        grid_spec=pltpu.PrefetchScalarGridSpec(
            num_scalar_prefetch=1,
            grid=grid,
            in_specs=[pl.BlockSpec((block_rows, LANE), lambda i, seed_ref: (i, 0))],
            out_specs=[
                pl.BlockSpec((block_rows, LANE), lambda i, seed_ref: (i, 0)),
                pl.BlockSpec((block_rows, LANE), lambda i, seed_ref: (i, 0)),
            ],
        ),
        compiler_params=pltpu.CompilerParams(dimension_semantics=("parallel",)),
    )(jnp.asarray([seed], jnp.int32), vmat)

    out_vals = out_vals.reshape(-1)[:nnz]
    mask = mask.reshape(-1)[:nnz]
    # TODO(synk): masked_select_nnz (dynamic-shape COO compaction) left to the
    # caller; dropped entries are zero-valued with mask == 0.
    return row, col, out_vals, mask


if __name__ == "__main__":
    key = jax.random.PRNGKey(0)
    k_row, k_col = jax.random.split(key, 2)

    num_nodes = 32
    nnz = 300
    row = jax.random.randint(k_row, (nnz,), 0, num_nodes, dtype=jnp.int32)
    col = jax.random.randint(k_col, (nnz,), 0, num_nodes, dtype=jnp.int32)
    values = jnp.ones((nnz,), jnp.float32)   # adjacency with unit edge weights

    dp = 0.5
    r, c, v, m = drop_adj(row, col, values, dp=dp, doscale=True,
                          training=True, seed=0)
    v = jax.block_until_ready(v)
    m = jax.block_until_ready(m)

    # sanity: surviving entries equal value*ratio, dropped entries are zero
    ratio = 1.0 / (1.0 - dp)
    ok = bool(jnp.all(jnp.where(m == 1, jnp.abs(v - ratio) < 1e-5, v == 0.0)))
    n_keep = int(jnp.sum(m.astype(jnp.int32)))
    ok = ok and (0 < n_keep < nnz)           # with dp=0.5 both outcomes occur

    # eval-mode / dp=0 path is identity
    _, _, v_eval, m_eval = drop_adj(row, col, values, dp=dp, training=False)
    ok = ok and bool(jnp.all(v_eval == values)) and bool(jnp.all(m_eval == 1))

    if ok:
        print("KERNEL_OK")
</pallas_src>

<mosaic_0001>
module attributes {stable_mosaic.version = 11 : i64} {
  func.func @_dropadj_kernel(%arg0: i32, %arg1: memref<1xi32, #tpu.memory_space<smem>>, %arg2: memref<3x128xf32, #tpu.memory_space<vmem>>, %arg3: memref<3x128xf32, #tpu.memory_space<vmem>>, %arg4: memref<3x128xi8, #tpu.memory_space<vmem>>) attributes {dimension_semantics = [#tpu.dimension_semantics<parallel>], iteration_bounds = array<i64: 1>, scalar_prefetch = 1 : i64, scratch_operands = 0 : i64, tpu.core_type = #tpu.core_type<tc>, window_params = [{transform_indices = @transform_0, window_bounds = array<i64: 3, 128>}, {transform_indices = @transform_1, window_bounds = array<i64: 3, 128>}, {transform_indices = @transform_2, window_bounds = array<i64: 3, 128>}]} {
    %c3_i32 = arith.constant 3 : i32
    %0 = arith.muli %arg0, %c3_i32 : i32
    %1 = tpu.iota {dimensions = array<i32: 0>} : vector<3x128xi32>
    %2 = tpu.iota {dimensions = array<i32: 1>} : vector<3x128xi32>
    %3 = vector.broadcast %0 : i32 to vector<3x128xi32>
    %4 = arith.addi %3, %1 : vector<3x128xi32>
    %c128_i32 = arith.constant 128 : i32
    %5 = vector.broadcast %c128_i32 : i32 to vector<3x128xi32>
    %6 = arith.muli %4, %5 : vector<3x128xi32>
    %7 = arith.addi %6, %2 : vector<3x128xi32>
    %c0 = arith.constant 0 : index
    %8 = memref.load %arg1[%c0] : memref<1xi32, #tpu.memory_space<smem>>
    %c-1640531527_i32 = arith.constant -1640531527 : i32
    %9 = arith.muli %8, %c-1640531527_i32 : i32
    %10 = vector.broadcast %9 : i32 to vector<3x128xi32>
    %11 = arith.xori %7, %10 : vector<3x128xi32>
    %c-1640531535_i32 = arith.constant -1640531535 : i32
    %12 = vector.broadcast %c-1640531535_i32 : i32 to vector<3x128xi32>
    %13 = arith.muli %11, %12 : vector<3x128xi32>
    %c16_i32 = arith.constant 16 : i32
    %14 = vector.broadcast %c16_i32 : i32 to vector<3x128xi32>
    %15 = arith.shrui %13, %14 : vector<3x128xi32>
    %16 = arith.xori %13, %15 : vector<3x128xi32>
    %c-2048144789_i32 = arith.constant -2048144789 : i32
    %17 = vector.broadcast %c-2048144789_i32 : i32 to vector<3x128xi32>
    %18 = arith.muli %16, %17 : vector<3x128xi32>
    %c13_i32 = arith.constant 13 : i32
    %19 = vector.broadcast %c13_i32 : i32 to vector<3x128xi32>
    %20 = arith.shrui %18, %19 : vector<3x128xi32>
    %21 = arith.xori %18, %20 : vector<3x128xi32>
    %c-1028477387_i32 = arith.constant -1028477387 : i32
    %22 = vector.broadcast %c-1028477387_i32 : i32 to vector<3x128xi32>
    %23 = arith.muli %21, %22 : vector<3x128xi32>
    %c16_i32_0 = arith.constant 16 : i32
    %24 = vector.broadcast %c16_i32_0 : i32 to vector<3x128xi32>
    %25 = arith.shrui %23, %24 : vector<3x128xi32>
    %26 = arith.xori %23, %25 : vector<3x128xi32>
    %c-2147483648_i32 = arith.constant -2147483648 : i32
    %27 = vector.broadcast %c-2147483648_i32 : i32 to vector<3x128xi32>
    %28 = arith.cmpi ugt, %26, %27 : vector<3x128xi32>
    %c300_i32 = arith.constant 300 : i32
    %29 = vector.broadcast %c300_i32 : i32 to vector<3x128xi32>
    %30 = arith.cmpi slt, %7, %29 : vector<3x128xi32>
    %31 = arith.andi %28, %30 : vector<3x128xi1>
    %c0_1 = arith.constant 0 : index
    %c0_2 = arith.constant 0 : index
    %32 = vector.load %arg2[%c0_1, %c0_2] : memref<3x128xf32, #tpu.memory_space<vmem>>, vector<3x128xf32>
    %cst = arith.constant 2.000000e+00 : f32
    %33 = vector.broadcast %cst : f32 to vector<3x128xf32>
    %34 = arith.mulf %32, %33 : vector<3x128xf32>
    %cst_3 = arith.constant 0.000000e+00 : f32
    %35 = vector.broadcast %cst_3 : f32 to vector<3x128xf32>
    %36 = arith.select %31, %34, %35 : vector<3x128xi1>, vector<3x128xf32>
    %c0_4 = arith.constant 0 : index
    %c0_5 = arith.constant 0 : index
    %37 = vector.load %arg3[%c0_4, %c0_5] : memref<3x128xf32, #tpu.memory_space<vmem>>, vector<3x128xf32>
    tpu.vector_store %arg3[%c0_4, %c0_5], %36 {strides = array<i32>} : memref<3x128xf32, #tpu.memory_space<vmem>>, vector<3x128xf32>,
    %38 = arith.extui %31 : vector<3x128xi1> to vector<3x128xi8>
    %c0_6 = arith.constant 0 : index
    %c0_7 = arith.constant 0 : index
    %39 = vector.load %arg4[%c0_6, %c0_7] : memref<3x128xi8, #tpu.memory_space<vmem>>, vector<3x128xi8>
    tpu.vector_store %arg4[%c0_6, %c0_7], %38 {strides = array<i32>} : memref<3x128xi8, #tpu.memory_space<vmem>>, vector<3x128xi8>,
    return
  }
  func.func @transform_0(%arg0: i32, %arg1: memref<1xi32, #tpu.memory_space<smem>>) -> (i32, i32) {
    %c0_i32 = arith.constant 0 : i32
    %c0_i32_0 = arith.constant 0 : i32
    return %arg0, %c0_i32 : i32, i32
  }
  func.func @transform_1(%arg0: i32, %arg1: memref<1xi32, #tpu.memory_space<smem>>) -> (i32, i32) {
    %c0_i32 = arith.constant 0 : i32
    %c0_i32_0 = arith.constant 0 : i32
    return %arg0, %c0_i32 : i32, i32
  }
  func.func @transform_2(%arg0: i32, %arg1: memref<1xi32, #tpu.memory_space<smem>>) -> (i32, i32) {
    %c0_i32 = arith.constant 0 : i32
    %c0_i32_0 = arith.constant 0 : i32
    return %arg0, %c0_i32 : i32, i32
  }
}

</mosaic_0001>

<bundles_post_ra>
// kernel: tpu_custom_call.1
= control target key start
LH: loop header
LB: loop body
LE: loop exit
PB: predicated region body
PF: predicated region fallthrough
CT: control target
= control target key end

     0   :  { %10 = vsyncpa [#allocation5], 0  ;;  %s248_s0 = inlined_call_operand.<no memory space> [shape: s32[1], index: 0, kind: input, shape index: {}]   ;;  %s249_s1 = inlined_call_operand.hbm [shape: f32[3,128], index: 1, kind: input, shape index: {}]   ;;  %s250_s2 = inlined_call_operand.hbm [shape: f32[3,128], index: 2, kind: output, shape index: {0}]   ;;  %s251_s3 = inlined_call_operand.hbm [shape: s8[3,128], index: 3, kind: output, shape index: {1}]  }
   0x1   :  { %11 = vsyncpa [#allocation6], 0 }
   0x2   :  { %12 = vsyncpa [#allocation9], 0  ;;  %s171_s12 = smov [#allocation4]   ;;  %s99_s16 = scalar_lea.hbm %s249_s1, 64 }
   0x3   :  { %s19_s13 = sshll.u32 %s171_s12, 4  ;;  %p100_p0 = scmp.ne.s32.totalorder %s249_s1, %s99_s16  ;;  %s20_s13 = int_to_ptr.vmem [resolvable:$true] %s19_s13 }
   0x4   :  { %p103_p1 = scmp.lt.u32.totalorder %s99_s16, %s249_s1 }
   0x6   :  { %p105_p2 = pnand %p103_p1, %p100_p0 }
   0x8   :  { %108 = shalt.err (!%p105_p2)
}
   0x9   :  { %s109_s21 = scalar_lea.vmem %s20_s13, 64  ;;  %p114_p4 = scmp.lt.s32.totalorder %s20_s13, %s20_s13 }
   0xa   :  { %p110_p3 = scmp.ne.s32.totalorder %s20_s13, %s109_s21  ;;  %p115_p5 = scmp.lt.s32.totalorder %s109_s21, %s109_s21 }
   0xc   :  { %p116_p6 = por %p115_p5, %p114_p4 }
   0xe   :  { %p117_p7 = pnand %p116_p6, %p110_p3 }
  0x10   :  { %120 = shalt.err (!%p117_p7)
}
  0x11   :  { %22 = dma.hbm_to_vmem [thread:$0]  %s249_s1, 64, %s20_s13, [#allocation5]  }
  0x12   :  { %165 = dma.done.wait [#allocation5], 64  }
  0x13   :  { %166 = vsyncadd [#allocation5], 4294967232  ;;  %v29_v0 = vlaneseq  ;;  %s38_s26 = smul.u32 2654435769, %s248_s0  ;;  %v53_v14 = vld [vmem:[#allocation4] sm:$0x7] }
  0x14   :  { %vm60_vm0 = vcmask 1040384   ;;  %vm61_vm1 = vsmask.f32 512  ;;  %v54_v17 = vmul.f32 2.0, %v53_v14  ;;  %s172_s0 = smov [#allocation7]   ;;  %s173_s27 = smov [#allocation8]  }
  0x15   :  { %v30_v1 = vshrl.u32 %v29_v0, 7  ;;  %v32_v2 = vand.u32 127, %v29_v0  ;;  %v39_v4 = vstv %s38_s26  ;;  %s72_s1 = sshll.u32 %s172_s0, 4  ;;  %vm210_vm4 = vmand %vm60_vm0, %vm61_vm1  ;;  %s82_s28 = sshll.u32 %s173_s27, 4  ;;  %v63_v20 = vld [vmem:[#allocation8] sm:$0x1]  ;;  %s73_s1 = int_to_ptr.vmem [resolvable:$true] %s72_s1  ;;  %s214_s28 = int_to_ptr.vmem [resolvable:$true] %s82_s28 }
  0x16   :  { %v174_v21 = vmov 0   ;;  %s121_s29 = scalar_lea.vmem %s73_s1, 64  ;;  %p126_p9 = scmp.lt.s32.totalorder %s73_s1, %s73_s1 }
  0x17   :  { %v35_v3 = vmul.u32 128, %v30_v1  ;;  %p122_p8 = scmp.ne.s32.totalorder %s73_s1, %s121_s29  ;;  %p127_p10 = scmp.lt.s32.totalorder %s121_s29, %s121_s29 }
  0x19   :  { %v36_v5 = vadd.s32 %v35_v3, %v32_v2  ;;  %p128_p11 = por %p127_p10, %p126_p9 }
  0x1b   :  { %v40_v6 = vxor.u32 %v39_v4, %v36_v5  ;;  %vm51_vm2 = vcmp.lt.s32.totalorder %v36_v5, 300  ;;  %p129_p12 = pnand %p128_p11, %p122_p8 }
  0x1d   :  { %v41_v7 = vmul.u32 2654435761, %v40_v6 }
  0x1f   :  { %v42_v8 = vshrl.u32 %v41_v7, 16 }
  0x21   :  { %v43_v9 = vxor.u32 %v42_v8, %v41_v7 }
  0x23   :  { %v44_v10 = vmul.u32 2246822507, %v43_v9 }
  0x25   :  { %v45_v11 = vshrl.u32 %v44_v10, 13 }
  0x27   :  { %v46_v12 = vxor.u32 %v45_v11, %v44_v10 }
  0x29   :  { %v47_v13 = vmul.u32 3266489909, %v46_v12 }
  0x2b   :  { %v48_v15 = vshrl.u32 %v47_v13, 16 }
  0x2d   :  { %v49_v16 = vxor.u32 %v48_v15, %v47_v13 }
  0x2f   :  { %vm50_vm3 = vcmp.gt.u32.totalorder %v49_v16, 2147483648 }
  0x30   :  { %vm52_vm5 = vmand %vm50_vm3, %vm51_vm2 }
  0x31   :  { %v55_v19 = vsel %vm52_vm5, %v54_v17, 0.0  ;;  %vm57_vm6 = vmpackc.low %vm52_vm5, %vm52_vm5 }
  0x32   :  { %56 = vst [vmem:[#allocation7] sm:$0x7] %v55_v19  ;;  %vm58_vm7 = vmpackc.even %vm57_vm6, %vm57_vm6 }
  0x33   :  { %v59_v22 = vsel %vm58_vm7, 16843009, %v174_v21 }
  0x34   :  { %132 = shalt.err (!%p129_p12)
}
  0x35   :  { %s133_s5 = scalar_lea.hbm %s250_s2, 64 }
  0x36   :  { %p134_p13 = scmp.ne.s32.totalorder %s250_s2, %s133_s5  ;;  %p137_p0 = scmp.lt.u32.totalorder %s133_s5, %s250_s2 }
  0x38   :  { %p139_p1 = pnand %p137_p0, %p134_p13 }
  0x3a   :  { %142 = shalt.err (!%p139_p1)
}
  0x3b   :  { %75 = dma.vmem_to_hbm [thread:$0]  %s73_s1, 64, %s250_s2, [#allocation6]   ;;  %v64_v23 = vsel %vm210_vm4, %v59_v22, %v63_v20 }
  0x3c   :  { %65 = vst [vmem:[#allocation8] sm:$0x1] %v64_v23  ;;  %s143_s12 = scalar_lea.vmem %s214_s28, 16  ;;  %s147_s13 = scalar_lea.vmem %s214_s28, 32 }
  0x3d   :  { %p144_p2 = scmp.ne.s32.totalorder %s214_s28, %s143_s12  ;;  %p148_p3 = scmp.lt.s32.totalorder %s214_s28, %s214_s28 }
  0x3e   :  { %p149_p4 = scmp.lt.s32.totalorder %s147_s13, %s143_s12 }
  0x40   :  { %p150_p5 = por %p149_p4, %p148_p3 }
  0x42   :  { %p151_p6 = pnand %p150_p5, %p144_p2 }
  0x44   :  { %154 = shalt.err (!%p151_p6)
}
  0x45   :  { %s155_s16 = scalar_lea.hbm %s251_s3, 16 }
  0x46   :  { %p156_p7 = scmp.ne.s32.totalorder %s251_s3, %s155_s16  ;;  %p159_p8 = scmp.lt.u32.totalorder %s155_s16, %s251_s3 }
  0x48   :  { %p161_p9 = pnand %p159_p8, %p156_p7 }
  0x4a   :  { %164 = shalt.err (!%p161_p9)
}
  0x4b   :  { %85 = dma.vmem_to_hbm [thread:$0]  %s214_s28, 16, %s251_s3, [#allocation9]  }
  0x4c   :  { %167 = dma.done.wait [#allocation6], 64  }
  0x4d   :  { %168 = vsyncadd [#allocation6], 4294967232 }
  0x4e   :  { %169 = dma.done.wait [#allocation9], 16  }
  0x4f   :  { %170 = vsyncadd [#allocation9], 4294967280 }
  0x50   :  { %92 = vsyncpa [#allocation5], 1 }
  0x51   :  { %93 = vsyncpa [#allocation6], 1 }
  0x52   :  { %94 = vsyncpa [#allocation9], 1 }

</bundles_post_ra>
